<compile_context>
chip_gen: v7x
topology: tpu7x:2x2x1
jax: 0.10.0
libtpu: 0.0.40
codegen_flags: <defaults>
</compile_context>

<pallas_src>
import jax
import jax.numpy as jnp
from jax.experimental import pallas as pl
from jax.experimental.pallas import tpu as pltpu

_LANE = 128
_ROW_CHUNK = 128
_F32 = jnp.float32
_BF16 = jnp.bfloat16


def _round_up(x, m):
    return ((x + m - 1) // m) * m


def _batch_tiling(batch):
    """Row-tile size / padded batch.

    * multiples of 128 (lane / MXU aligned, v5e-safe)
    * at least 2 row tiles whenever possible so the "parallel" grid axis can
      span both v7x TensorCores (e.g. B=256 -> tm=128, not 256)
    * up to 512 rows per tile for large batches to amortize per-step overhead.
    """
    b_pad = _round_up(max(int(batch), 1), _LANE)
    tm = _LANE
    for cand in (512, 256):
        if b_pad % cand == 0 and b_pad // cand >= 2:
            tm = cand
            break
    return tm, b_pad


def _col_tiling(b_pad, tm):
    """Column-tile size for the [B, B] logits.

    Single column tile (tn = b_pad) whenever the f32 logits block stays under
    ~4 MiB per buffer (8 MiB double-buffered) -> comfortable even on v7x's
    64 MiB physical VMEM. Collapsing the inner axis removes redundant
    per-column grid steps and makes logits writebacks lane-dense.
    """
    cap = max(_LANE, (4 * 1024 * 1024) // (tm * 4))
    cap -= cap % _LANE
    if b_pad <= cap:
        return b_pad
    best = _LANE
    t = 2 * _LANE
    while t <= cap:
        if b_pad % t == 0:
            best = t
        t += _LANE
    return best


def _vmem_limit(footprint_bytes):
    # Scoped VMEM limit derived from the actual tile footprint (2x slack),
    # clamped so it stays safe on v7x (64 MiB physical VMEM).
    return int(min(max(2 * footprint_bytes, 16 * 1024 * 1024),
                   40 * 1024 * 1024))


def _pad_rows(x, rows):
    if x.shape[0] == rows:
        return x
    return jnp.pad(x, ((0, rows - x.shape[0]), (0, 0)))


def _pad2(x, rows, cols):
    return jnp.pad(x, ((0, rows - x.shape[0]), (0, cols - x.shape[1])))


# --------------------------- in-kernel building blocks ----------------------

def _for_each_row_chunk(n_rows, body):
    """Apply body(row_offset) over 128-row sub-blocks (unrolled fori_loop) so
    large row tiles (tm=512) never keep a [512,128] f32 intermediate live."""
    n = max(n_rows // _ROW_CHUNK, 1)

    def step(s, carry):
        body(pl.multiple_of(s * _ROW_CHUNK, _ROW_CHUNK))
        return carry

    jax.lax.fori_loop(0, n, step, 0, unroll=True)


def _linear(xs, w_refs, b_ref):
    """sum_i bf16(x_i) @ W_i + b — bf16 MXU operands, f32 accumulate/bias."""
    acc = b_ref[...]                      # [1, N] f32, broadcasts over rows
    for x, w_ref in zip(xs, w_refs):
        acc = acc + jnp.dot(x.astype(_BF16), w_ref[...],
                            preferred_element_type=_F32)
    return acc


def _actor_head(ag, dg, aw1_ag, aw1_dg, ab1, aw2, ab2):
    # tanh(relu(ag@W1a + dg@W1b + b1) @ W2 + b2)   (concat-free split matmuls)
    h = jnp.maximum(_linear([ag, dg], [aw1_ag, aw1_dg], ab1), 0.0)
    return jnp.tanh(_linear([h], [aw2], ab2))          # [rows, Ap] f32


def _phi_head(ag, act, sw1_ag, sw1_act, sb1, sw2, sb2):
    h = jnp.maximum(_linear([ag, act], [sw1_ag, sw1_act], sb1), 0.0)
    return _linear([h], [sw2], sb2)                    # [rows, Ep] f32


def _psi_head(dg, gw1, gb1, gw2, gb2):
    h = jnp.maximum(_linear([dg], [gw1], gb1), 0.0)
    return _linear([h], [gw2], gb2)                    # [rows, Ep] f32


# --------------------------------- kernels ----------------------------------

def _psi_transpose_kernel(dg_ref, gw1_ref, gb1_ref, gw2_ref, gb2_ref,
                          psit_ref):
    # psi tower for one batch tile, emitted TRANSPOSED ([e_p, tile]) in bf16 so
    # the downstream logits matmul is a clean [tm,K]@[K,tn] MXU feed with no
    # per-step vxpose. Transpose cost is paid once per batch tile here.
    def rows(r):
        psi = _psi_head(dg_ref[pl.ds(r, _ROW_CHUNK), :],
                        gw1_ref, gb1_ref, gw2_ref, gb2_ref)
        psit_ref[:, pl.ds(r, _ROW_CHUNK)] = jnp.transpose(psi).astype(_BF16)

    _for_each_row_chunk(dg_ref.shape[0], rows)


def _fused_actor_value_kernel(
        ag_ref, dg_ref, psit_ref,
        aw1_ag_ref, aw1_dg_ref, ab1_ref, aw2_ref, ab2_ref,
        sw1_ag_ref, sw1_act_ref, sb1_ref, sw2_ref, sb2_ref,
        act_ref, logits_ref, phi_scratch):
    # Row-tile work (actor tanh action + phi embedding) runs once per row
    # tile, at the first column step, and is cached in bf16 VMEM scratch
    # across the inner column axis. The tanh action never leaves VMEM before
    # phi. NOTE: correctness of this cache relies on axis 1 being "arbitrary"
    # (sequential on one core, starting at j==0); it must never be marked
    # parallel or sharded across cores.
    @pl.when(pl.program_id(1) == 0)
    def _():
        def rows(r):
            ag = ag_ref[pl.ds(r, _ROW_CHUNK), :]
            dg = dg_ref[pl.ds(r, _ROW_CHUNK), :]
            act = _actor_head(ag, dg, aw1_ag_ref, aw1_dg_ref, ab1_ref,
                              aw2_ref, ab2_ref)
            act_ref[pl.ds(r, _ROW_CHUNK), :] = act        # lane-dense f32
            phi = _phi_head(ag, act, sw1_ag_ref, sw1_act_ref, sb1_ref,
                            sw2_ref, sb2_ref)
            phi_scratch[pl.ds(r, _ROW_CHUNK), :] = phi.astype(_BF16)

        _for_each_row_chunk(ag_ref.shape[0], rows)

    # Pure MXU inner step: bf16 [tm, e_p] @ bf16 [e_p, tn] -> f32 [tm, tn].
    logits_ref[...] = jnp.dot(phi_scratch[...], psit_ref[...],
                              preferred_element_type=_F32)


def _value_only_kernel(ag_ref, act_ref, psit_ref,
                       sw1_ag_ref, sw1_act_ref, sb1_ref, sw2_ref, sb2_ref,
                       logits_ref, phi_scratch):
    # Same row-work caching as the fused kernel: phi depends only on the row
    # tile, compute it once at j==0 into bf16 scratch.
    @pl.when(pl.program_id(1) == 0)
    def _():
        def rows(r):
            phi = _phi_head(ag_ref[pl.ds(r, _ROW_CHUNK), :],
                            act_ref[pl.ds(r, _ROW_CHUNK), :],
                            sw1_ag_ref, sw1_act_ref, sb1_ref,
                            sw2_ref, sb2_ref)
            phi_scratch[pl.ds(r, _ROW_CHUNK), :] = phi.astype(_BF16)

        _for_each_row_chunk(ag_ref.shape[0], rows)

    logits_ref[...] = jnp.dot(phi_scratch[...], psit_ref[...],
                              preferred_element_type=_F32)


def _actor_only_kernel(ag_ref, dg_ref,
                       aw1_ag_ref, aw1_dg_ref, ab1_ref, aw2_ref, ab2_ref,
                       act_ref):
    def rows(r):
        act_ref[pl.ds(r, _ROW_CHUNK), :] = _actor_head(
            ag_ref[pl.ds(r, _ROW_CHUNK), :], dg_ref[pl.ds(r, _ROW_CHUNK), :],
            aw1_ag_ref, aw1_dg_ref, ab1_ref, aw2_ref, ab2_ref)

    _for_each_row_chunk(ag_ref.shape[0], rows)


# ----------------------------- pallas_call wrappers --------------------------

def _const2(shape):
    return pl.BlockSpec(shape, lambda i, j: (0, 0))


def _const1(shape):
    return pl.BlockSpec(shape, lambda i: (0, 0))


def psi_transposed(dg_pad, vp, tm):
    """One-shot psi precompute: [e_p, b_pad] bf16, already transposed."""
    b_pad, D = dg_pad.shape
    hp = vp["g_w1"].shape[1]
    e_p = vp["g_w2"].shape[1]

    footprint = (2 * (tm * D * 4 + e_p * tm * 2)
                 + 2 * 2 * (D * hp + hp * e_p) + 2 * 4 * (hp + e_p))

    return pl.pallas_call(
        _psi_transpose_kernel,
        grid=(b_pad // tm,),
        in_specs=[
            pl.BlockSpec((tm, D), lambda j: (j, 0)),
            _const1((D, hp)), _const1((1, hp)),
            _const1((hp, e_p)), _const1((1, e_p)),
        ],
        out_specs=pl.BlockSpec((e_p, tm), lambda j: (0, j)),
        out_shape=jax.ShapeDtypeStruct((e_p, b_pad), _BF16),
        compiler_params=pltpu.CompilerParams(
            dimension_semantics=("parallel",),
            vmem_limit_bytes=_vmem_limit(footprint)),
    )(dg_pad, vp["g_w1"], vp["g_b1"], vp["g_w2"], vp["g_b2"])


def fused_actor_value(ag, dg, ap, vp):
    """psi precompute + one fused pallas_call -> (action_padded, logits_padded)."""
    B, D = ag.shape
    tm, b_pad = _batch_tiling(B)
    tn = _col_tiling(b_pad, tm)
    hp = ap["w1_ag"].shape[1]
    a_p = ap["w2"].shape[1]
    e_p = vp["sa_w2"].shape[1]

    ag_p = _pad_rows(ag, b_pad)
    dg_p = _pad_rows(dg, b_pad)

    psi_t = psi_transposed(dg_p, vp, tm)    # [e_p, b_pad] bf16

    row = lambda i, j: (i, 0)

    footprint = (
        2 * (2 * tm * D * 4 + e_p * tn * 2)                               # ins
        + 2 * 2 * (2 * D * hp + hp * a_p + D * hp + a_p * hp + hp * e_p)  # W
        + 2 * 4 * (2 * hp + a_p + e_p)                                    # b
        + 2 * (tm * a_p * 4 + tm * tn * 4)                                # outs
        + tm * e_p * 2)                                                   # phi

    act_pad, logits_pad = pl.pallas_call(
        _fused_actor_value_kernel,
        grid=(b_pad // tm, b_pad // tn),
        in_specs=[
            pl.BlockSpec((tm, D), row),                   # achieved_goal rows
            pl.BlockSpec((tm, D), row),                   # desired_goal rows
            pl.BlockSpec((e_p, tn), lambda i, j: (0, j)),  # psi^T columns
            # actor weights (VMEM-resident, constant index_map)
            _const2((D, hp)), _const2((D, hp)), _const2((1, hp)),
            _const2((hp, a_p)), _const2((1, a_p)),
            # phi tower weights
            _const2((D, hp)), _const2((a_p, hp)), _const2((1, hp)),
            _const2((hp, e_p)), _const2((1, e_p)),
        ],
        out_specs=[
            pl.BlockSpec((tm, a_p), lambda i, j: (i, 0)),
            pl.BlockSpec((tm, tn), lambda i, j: (i, j)),
        ],
        out_shape=[
            jax.ShapeDtypeStruct((b_pad, a_p), _F32),
            jax.ShapeDtypeStruct((b_pad, b_pad), _F32),
        ],
        scratch_shapes=[pltpu.VMEM((tm, e_p), _BF16)],
        compiler_params=pltpu.CompilerParams(
            dimension_semantics=("parallel", "arbitrary"),
            vmem_limit_bytes=_vmem_limit(footprint)),
    )(ag_p, dg_p, psi_t,
      ap["w1_ag"], ap["w1_dg"], ap["b1"], ap["w2"], ap["b2"],
      vp["sa_w1_ag"], vp["sa_w1_act"], vp["sa_b1"], vp["sa_w2"], vp["sa_b2"])
    return act_pad, logits_pad


def actor_forward(ag, dg, ap):
    B, D = ag.shape
    tm, b_pad = _batch_tiling(B)
    hp = ap["w1_ag"].shape[1]
    a_p = ap["w2"].shape[1]

    ag_p = _pad_rows(ag, b_pad)
    dg_p = _pad_rows(dg, b_pad)
    row = lambda i: (i, 0)

    footprint = (2 * 2 * tm * D * 4
                 + 2 * 2 * (2 * D * hp + hp * a_p) + 2 * 4 * (hp + a_p)
                 + 2 * tm * a_p * 4)

    return pl.pallas_call(
        _actor_only_kernel,
        grid=(b_pad // tm,),
        in_specs=[
            pl.BlockSpec((tm, D), row),
            pl.BlockSpec((tm, D), row),
            _const1((D, hp)), _const1((D, hp)), _const1((1, hp)),
            _const1((hp, a_p)), _const1((1, a_p)),
        ],
        out_specs=pl.BlockSpec((tm, a_p), row),
        out_shape=jax.ShapeDtypeStruct((b_pad, a_p), _F32),
        compiler_params=pltpu.CompilerParams(
            dimension_semantics=("parallel",),
            vmem_limit_bytes=_vmem_limit(footprint)),
    )(ag_p, dg_p, ap["w1_ag"], ap["w1_dg"], ap["b1"], ap["w2"], ap["b2"])


def value_forward(ag, action, dg, vp):
    B, D = ag.shape
    tm, b_pad = _batch_tiling(B)
    tn = _col_tiling(b_pad, tm)
    hp = vp["sa_w1_ag"].shape[1]
    a_p = vp["sa_w1_act"].shape[0]
    e_p = vp["sa_w2"].shape[1]

    ag_p = _pad_rows(ag, b_pad)
    dg_p = _pad_rows(dg, b_pad)
    act_p = _pad2(action, b_pad, a_p)        # lane-dense padded action input

    psi_t = psi_transposed(dg_p, vp, tm)     # [e_p, b_pad] bf16

    row = lambda i, j: (i, 0)

    footprint = (2 * (tm * D * 4 + tm * a_p * 4 + e_p * tn * 2)
                 + 2 * 2 * (D * hp + a_p * hp + hp * e_p) + 2 * 4 * (hp + e_p)
                 + 2 * tm * tn * 4
                 + tm * e_p * 2)

    return pl.pallas_call(
        _value_only_kernel,
        grid=(b_pad // tm, b_pad // tn),
        in_specs=[
            pl.BlockSpec((tm, D), row),
            pl.BlockSpec((tm, a_p), row),
            pl.BlockSpec((e_p, tn), lambda i, j: (0, j)),
            _const2((D, hp)), _const2((a_p, hp)), _const2((1, hp)),
            _const2((hp, e_p)), _const2((1, e_p)),
        ],
        out_specs=pl.BlockSpec((tm, tn), lambda i, j: (i, j)),
        out_shape=jax.ShapeDtypeStruct((b_pad, b_pad), _F32),
        scratch_shapes=[pltpu.VMEM((tm, e_p), _BF16)],
        compiler_params=pltpu.CompilerParams(
            dimension_semantics=("parallel", "arbitrary"),
            vmem_limit_bytes=_vmem_limit(footprint)),
    )(ag_p, act_p, psi_t,
      vp["sa_w1_ag"], vp["sa_w1_act"], vp["sa_b1"], vp["sa_w2"], vp["sa_b2"])


# ------------------- ContrastiveRLNetwork (JAX/Pallas port) ------------------

class ContrastiveRLNetworkPallas:
    """Port of ContrastiveRLNetwork with Identity encoder, MLP actor, and
    contrastive MLP value towers. Weights are zero-padded to 128-lane-dense
    shapes (exact: pads contribute nothing) and stored bf16 for the MXU."""

    def __init__(self, obs_dim, action_dim, hidden=32, embed=32, seed=42):
        self.concat_keys = ["achieved_goal", "desired_goal"]
        self.forward_concat_dim = -1          # flat float obs -> concat_dim = -1
        self.obs_dim = obs_dim
        self.action_dim = action_dim

        hp = _round_up(hidden, _LANE)
        ep = _round_up(embed, _LANE)
        a_p = _round_up(action_dim, _LANE)
        self._hp, self._ep, self._ap = hp, ep, a_p

        key = jax.random.PRNGKey(seed)
        ks = jax.random.split(key, 6)

        def init(k, shape, fan_in):
            return (jax.random.normal(k, shape, dtype=_F32)
                    / jnp.sqrt(jnp.float32(fan_in)))

        D, A, H, E = obs_dim, action_dim, hidden, embed

        # actor on concat(achieved, desired): W1 split row-wise -> no concat.
        aw1 = init(ks[0], (2 * D, H), 2 * D)
        aw2 = init(ks[1], (H, A), H)
        # phi tower on concat(achieved, action): W1 split the same way.
        sw1 = init(ks[2], (D + A, H), D + A)
        sw2 = init(ks[3], (H, E), H)
        # psi tower on desired_goal.
        gw1 = init(ks[4], (D, H), D)
        gw2 = init(ks[5], (H, E), H)

        def wpad(w, rows, cols):              # zero-pad, store bf16 for MXU
            return _pad2(w, rows, cols).astype(_BF16)

        def bpad(cols):                       # biases stay f32 (f32 epilogues)
            return jnp.zeros((1, cols), _F32)

        self.actor_params = {
            "w1_ag": wpad(aw1[:D], D, hp),
            "w1_dg": wpad(aw1[D:], D, hp),
            "b1": bpad(hp),
            "w2": wpad(aw2, hp, a_p),
            "b2": bpad(a_p),
        }
        self.value_params = {
            "sa_w1_ag": wpad(sw1[:D], D, hp),
            "sa_w1_act": wpad(sw1[D:], a_p, hp),
            "sa_b1": bpad(hp),
            "sa_w2": wpad(sw2, hp, ep),
            "sa_b2": bpad(ep),
            "g_w1": wpad(gw1, D, hp),
            "g_b1": bpad(hp),
            "g_w2": wpad(gw2, hp, ep),
            "g_b2": bpad(ep),
        }

    # encoder_class=None -> nn.Identity
    def encoder(self, x):
        return x

    def format_policy_obs(self, obs):
        # Kept for API parity; the Pallas path consumes the split inputs
        # directly (concat is folded into split W1 blocks inside the kernel).
        assert ("observation" not in self.concat_keys
                and "achieved_goal" in self.concat_keys
                and "desired_goal" in self.concat_keys)
        return jnp.concatenate([obs[k] for k in self.concat_keys],
                               axis=self.forward_concat_dim)

    def format_value_input(self, obs, action):
        assert "achieved_goal" in obs and "desired_goal" in obs
        return (obs["achieved_goal"], action, obs["desired_goal"])

    def actor_and_value(self, obs):
        """Fused path: psi precompute + one fused call -> (action, logits)."""
        ag = self.encoder(obs["achieved_goal"]).astype(_F32)
        dg = self.encoder(obs["desired_goal"]).astype(_F32)
        B = ag.shape[0]
        act_pad, logits_pad = fused_actor_value(
            ag, dg, self.actor_params, self.value_params)
        return act_pad[:B, :self.action_dim], logits_pad[:B, :B]

    def actor(self, obs):
        ag = self.encoder(obs["achieved_goal"]).astype(_F32)
        dg = self.encoder(obs["desired_goal"]).astype(_F32)
        B = ag.shape[0]
        act_pad = actor_forward(ag, dg, self.actor_params)
        return act_pad[:B, :self.action_dim]

    def value(self, obs, action):
        ag, action, dg = self.format_value_input(obs, action)
        B = ag.shape[0]
        logits_pad = value_forward(ag.astype(_F32), action.astype(_F32),
                                   dg.astype(_F32), self.value_params)
        return logits_pad[:B, :B]


# ---------------------------------- main ------------------------------------

if __name__ == "__main__":
    B, D, A = 8, 16, 4          # batch, goal-obs dim, action dim
    H, E = 32, 32               # logical hidden / embedding dims

    key = jax.random.PRNGKey(0)
    k1, k2 = jax.random.split(key, 2)
    obs = {
        "achieved_goal": jax.random.normal(k1, (B, D), dtype=jnp.float32),
        "desired_goal": jax.random.normal(k2, (B, D), dtype=jnp.float32),
    }

    net = ContrastiveRLNetworkPallas(obs_dim=D, action_dim=A, hidden=H, embed=E)

    # Fused path: action and [B,B] contrastive logits.
    act, logits = net.actor_and_value(obs)

    # Separate actor / value paths (module API parity) must agree with fused.
    act_sep = net.actor(obs)
    logits_sep = net.value(obs, act_sep)

    jax.block_until_ready((act, logits, act_sep, logits_sep))

    assert act.shape == (B, A)
    assert logits.shape == (B, B)
    assert bool(jnp.allclose(act, act_sep, atol=1e-3, rtol=1e-3))
    assert bool(jnp.allclose(logits, logits_sep, atol=1e-3, rtol=1e-3))

    # TODO(synk): the original forward() raises NotImplementedError; the
    # container's actor/value sub-modules are user-supplied, so synthetic MLP
    # towers are used here.
    print("KERNEL_OK")
</pallas_src>

<mosaic_0001>
module attributes {stable_mosaic.version = 11 : i64} {
  func.func @_psi_transpose_kernel(%arg0: i32, %arg1: memref<128x16xf32, #tpu.memory_space<vmem>>, %arg2: memref<16x128xbf16, #tpu.memory_space<vmem>>, %arg3: memref<1x128xf32, #tpu.memory_space<vmem>>, %arg4: memref<128x128xbf16, #tpu.memory_space<vmem>>, %arg5: memref<1x128xf32, #tpu.memory_space<vmem>>, %arg6: memref<128x128xbf16, #tpu.memory_space<vmem>>) attributes {dimension_semantics = [#tpu.dimension_semantics<parallel>], iteration_bounds = array<i64: 1>, scalar_prefetch = 0 : i64, scratch_operands = 0 : i64, tpu.core_type = #tpu.core_type<tc>, window_params = [{transform_indices = @transform_0, window_bounds = array<i64: 128, 16>}, {pipeline_mode = #tpu.pipeline_mode<synchronous>, transform_indices = @transform_1, window_bounds = array<i64: 16, 128>}, {pipeline_mode = #tpu.pipeline_mode<synchronous>, transform_indices = @transform_2, window_bounds = array<i64: 1, 128>}, {pipeline_mode = #tpu.pipeline_mode<synchronous>, transform_indices = @transform_3, window_bounds = array<i64: 128, 128>}, {pipeline_mode = #tpu.pipeline_mode<synchronous>, transform_indices = @transform_4, window_bounds = array<i64: 1, 128>}, {transform_indices = @transform_5, window_bounds = array<i64: 128, 128>}]} {
    %c0_i32 = arith.constant 0 : i32
    %c128_i32 = arith.constant 128 : i32
    %0 = arith.muli %c0_i32, %c128_i32 : i32
    %1 = tpu.assume_multiple %0, 128 : i32
    %2 = arith.index_cast %1 : i32 to index
    %c0 = arith.constant 0 : index
    %3 = vector.load %arg1[%2, %c0] : memref<128x16xf32, #tpu.memory_space<vmem>>, vector<128x16xf32>
    %c0_0 = arith.constant 0 : index
    %c0_1 = arith.constant 0 : index
    %4 = vector.load %arg3[%c0_0, %c0_1] : memref<1x128xf32, #tpu.memory_space<vmem>>, vector<1x128xf32>
    %5 = arith.truncf %3 : vector<128x16xf32> to vector<128x16xbf16>
    %c0_2 = arith.constant 0 : index
    %c0_3 = arith.constant 0 : index
    %6 = vector.load %arg2[%c0_2, %c0_3] : memref<16x128xbf16, #tpu.memory_space<vmem>>, vector<16x128xbf16>
    %cst = arith.constant dense<0.000000e+00> : vector<128x128xf32>
    %7 = tpu.matmul %5, %6, %cst {dimension_numbers = #tpu.dot_dimension_numbers<[1], [0], [0], [1], [0, 0, 1, 1], [], []>} : vector<128x16xbf16>, vector<16x128xbf16>, vector<128x128xf32> -> vector<128x128xf32>
    %8 = vector.broadcast %4 : vector<1x128xf32> to vector<128x128xf32>
    %9 = arith.addf %8, %7 : vector<128x128xf32>
    %cst_4 = arith.constant 0.000000e+00 : f32
    %10 = vector.broadcast %cst_4 : f32 to vector<128x128xf32>
    %11 = arith.maximumf %9, %10 : vector<128x128xf32>
    %c0_5 = arith.constant 0 : index
    %c0_6 = arith.constant 0 : index
    %12 = vector.load %arg5[%c0_5, %c0_6] : memref<1x128xf32, #tpu.memory_space<vmem>>, vector<1x128xf32>
    %13 = arith.truncf %11 : vector<128x128xf32> to vector<128x128xbf16>
    %c0_7 = arith.constant 0 : index
    %c0_8 = arith.constant 0 : index
    %14 = vector.load %arg4[%c0_7, %c0_8] : memref<128x128xbf16, #tpu.memory_space<vmem>>, vector<128x128xbf16>
    %cst_9 = arith.constant dense<0.000000e+00> : vector<128x128xf32>
    %15 = tpu.matmul %13, %14, %cst_9 {dimension_numbers = #tpu.dot_dimension_numbers<[1], [0], [0], [1], [0, 0, 1, 1], [], []>} : vector<128x128xbf16>, vector<128x128xbf16>, vector<128x128xf32> -> vector<128x128xf32>
    %16 = vector.broadcast %12 : vector<1x128xf32> to vector<128x128xf32>
    %17 = arith.addf %16, %15 : vector<128x128xf32>
    %18 = tpu.transpose %17, [1, 0] : vector<128x128xf32> -> vector<128x128xf32>
    %19 = arith.truncf %18 : vector<128x128xf32> to vector<128x128xbf16>
    %c0_10 = arith.constant 0 : index
    %20 = arith.index_cast %1 : i32 to index
    %21 = vector.load %arg6[%c0_10, %20] : memref<128x128xbf16, #tpu.memory_space<vmem>>, vector<128x128xbf16>
    tpu.vector_store %arg6[%c0_10, %20], %19 {strides = array<i32>} : memref<128x128xbf16, #tpu.memory_space<vmem>>, vector<128x128xbf16>,
    %c1_i32 = arith.constant 1 : i32
    return
  }
  func.func @transform_0(%arg0: i32) -> (i32, i32) {
    %c0_i32 = arith.constant 0 : i32
    %c0_i32_0 = arith.constant 0 : i32
    return %arg0, %c0_i32 : i32, i32
  }
  func.func @transform_1(%arg0: i32) -> (i32, i32) {
    %c0_i32 = arith.constant 0 : i32
    %c0_i32_0 = arith.constant 0 : i32
    %c0_i32_1 = arith.constant 0 : i32
    return %c0_i32, %c0_i32_0 : i32, i32
  }
  func.func @transform_2(%arg0: i32) -> (i32, i32) {
    %c0_i32 = arith.constant 0 : i32
    %c0_i32_0 = arith.constant 0 : i32
    %c0_i32_1 = arith.constant 0 : i32
    return %c0_i32, %c0_i32_0 : i32, i32
  }
  func.func @transform_3(%arg0: i32) -> (i32, i32) {
    %c0_i32 = arith.constant 0 : i32
    %c0_i32_0 = arith.constant 0 : i32
    %c0_i32_1 = arith.constant 0 : i32
    return %c0_i32, %c0_i32_0 : i32, i32
  }
  func.func @transform_4(%arg0: i32) -> (i32, i32) {
    %c0_i32 = arith.constant 0 : i32
    %c0_i32_0 = arith.constant 0 : i32
    %c0_i32_1 = arith.constant 0 : i32
    return %c0_i32, %c0_i32_0 : i32, i32
  }
  func.func @transform_5(%arg0: i32) -> (i32, i32) {
    %c0_i32 = arith.constant 0 : i32
    %c0_i32_0 = arith.constant 0 : i32
    return %c0_i32, %arg0 : i32, i32
  }
}

</mosaic_0001>

<bundles_post_ra>
// kernel: tpu_custom_call.1
= control target key start
LH: loop header
LB: loop body
LE: loop exit
PB: predicated region body
PF: predicated region fallthrough
CT: control target
= control target key end

     0   :  { %vm55_vm0 = vcmask 130048   ;;  %s894_s0 = inlined_call_operand.vmem [shape: f32[128,16], index: 0, kind: input, shape index: {}]   ;;  %s895_s1 = inlined_call_operand.vmem [shape: bf16[16,128], index: 1, kind: input, shape index: {}]   ;;  %s896_s2 = inlined_call_operand.vmem [shape: f32[1,128], index: 2, kind: input, shape index: {}]   ;;  %s897_s3 = inlined_call_operand.vmem [shape: bf16[128,128], index: 3, kind: input, shape index: {}]   ;;  %s898_s4 = inlined_call_operand.vmem [shape: f32[1,128], index: 4, kind: input, shape index: {}]   ;;  %s899_s5 = inlined_call_operand.hbm [shape: bf16[128,128], index: 5, kind: output, shape index: {}]  }
   0x1   :  { %v727_v0 = vld [vmem:[%s895_s1] sm:$0xff]   ;;  %v23_v2 = vld [vmem:[%s894_s0 + $0x8] sm:$0xff]  ;;  %v24_v3 = vld [vmem:[%s894_s0 + $0x10] sm:$0xff] }
   0x2   :  { %v22_v1 = vld [vmem:[%s894_s0] sm:$0xff]  ;;  %658 = vmatprep.subr.bf16.mxu0 %v727_v0  ;;  %v25_v5 = vld [vmem:[%s894_s0 + $0x18] sm:$0xff]  ;;  %v27_v7 = vld [vmem:[%s894_s0 + $0x28] sm:$0xff] }
   0x3   :  { %v39_v4 = vpack.c.bf16 %v23_v2, %v22_v1  ;;  %v26_v6 = vld [vmem:[%s894_s0 + $0x20] sm:$0xff]  ;;  %659 = vmatpush3.bf16.msra.mxu0 %v727_v0  ;;  %v40_v8 = vpack.c.bf16 %v25_v5, %v24_v3  ;;  %v28_v10 = vld [vmem:[%s894_s0 + $0x30] sm:$0xff]  ;;  %v29_v11 = vld [vmem:[%s894_s0 + $0x38] sm:$0xff] }
   0x4   :  { %v41_v9 = vpack.c.bf16 %v27_v7, %v26_v6  ;;  %v30_v12 = vld [vmem:[%s894_s0 + $0x40] sm:$0xff]  ;;  %v31_v13 = vld [vmem:[%s894_s0 + $0x48] sm:$0xff]  ;;  %v42_v16 = vpack.c.bf16 %v29_v11, %v28_v10  ;;  %v730_v18 = vld [vmem:[%s897_s3 + $0x10] sm:$0xff]  }
   0x5   :  { %660 = vmatprep.mubr.msk.bf16.mxu0 %vm55_vm0, %v39_v4  ;;  %v728_v14 = vld [vmem:[%s897_s3] sm:$0xff]   ;;  %v729_v15 = vld [vmem:[%s897_s3 + $0x8] sm:$0xff]   ;;  %v43_v17 = vpack.c.bf16 %v31_v13, %v30_v12 }
   0x6   :  { %661 = vmatmul.mubr.msk.bf16.vlgmr.msra.gmra.mrb[0].mxu0 %vm55_vm0, %v40_v8  ;;  %676 = vmatprep.subr.bf16.mxu0 %v728_v14 }
   0x7   :  { %664 = vmatprep.mubr.msk.bf16.mxu0 %vm55_vm0, %v41_v9  ;;  %708 = vmatprep.subr.bf16.mxu1 %v728_v14 }
   0x8   :  { %677 = vmatpush3.bf16.msra.mxu0 %v728_v14  ;;  %716 = vmatpush3.bf16.msra.mxu1 %v728_v14 }
   0x9   :  { %678 = vmatprep.subr.bf16.mxu0 %v729_v15  ;;  %709 = vmatprep.subr.bf16.mxu1 %v729_v15 }
   0xc   :  { %717 = vmatpush3.bf16.msra.mxu1 %v729_v15 }
   0xe   :  { %665 = vmatmul.mubr.msk.bf16.gmra.mrb[4].mxu0 %vm55_vm0, %v42_v16 }
   0xf   :  { %10 = vsyncpa [#allocation3], 0  ;;  %668 = vmatprep.mubr.msk.bf16.mxu0 %vm55_vm0, %v43_v17  ;;  %v32_v19 = vld [vmem:[%s894_s0 + $0x50] sm:$0xff]  ;;  %v33_v20 = vld [vmem:[%s894_s0 + $0x58] sm:$0xff]  ;;  %679 = vmatpush3.bf16.msra.mxu0 %v729_v15 }
  0x10   :  { %v34_v21 = vld [vmem:[%s894_s0 + $0x60] sm:$0xff]  ;;  %v35_v22 = vld [vmem:[%s894_s0 + $0x68] sm:$0xff]  ;;  %680 = vmatprep.subr.bf16.mxu0 %v730_v18  ;;  %v731_v23 = vld [vmem:[%s897_s3 + $0x18] sm:$0xff]   ;;  %710 = vmatprep.subr.bf16.mxu1 %v730_v18  ;;  %v44_v24 = vpack.c.bf16 %v33_v20, %v32_v19 }
  0x11   :  { %718 = vmatpush3.bf16.msra.mxu1 %v730_v18  ;;  %v45_v25 = vpack.c.bf16 %v35_v22, %v34_v21  ;;  %v732_v26 = vld [vmem:[%s897_s3 + $0x20] sm:$0xff]   ;;  %v36_v27 = vld [vmem:[%s894_s0 + $0x70] sm:$0xff]  ;;  %v37_v28 = vld [vmem:[%s894_s0 + $0x78] sm:$0xff] }
  0x12   :  { %711 = vmatprep.subr.bf16.mxu1 %v731_v23  ;;  %v733_v29 = vld [vmem:[%s897_s3 + $0x28] sm:$0xff]   ;;  %v46_v30 = vpack.c.bf16 %v37_v28, %v36_v27  ;;  %v734_v31 = vld [vmem:[%s897_s3 + $0x30] sm:$0xff]   ;;  %v735_v32 = vld [vmem:[%s897_s3 + $0x38] sm:$0xff]  }
  0x13   :  { %681 = vmatpush3.bf16.msra.mxu0 %v730_v18  ;;  %v544_v33 = vld [vmem:[%s896_s2] ss:$0 sm:$0xff] }
  0x14   :  { %682 = vmatprep.subr.bf16.mxu0 %v731_v23 }
  0x15   :  { %719 = vmatpush3.bf16.msra.mxu1 %v731_v23 }
  0x16   :  { %669 = vmatmul.mubr.msk.bf16.gmra.mrb[8].mxu0 %vm55_vm0, %v44_v24  ;;  %712 = vmatprep.subr.bf16.mxu1 %v732_v26 }
  0x17   :  { %672 = vmatprep.mubr.msk.bf16.mxu0 %vm55_vm0, %v45_v25  ;;  %683 = vmatpush3.bf16.msra.mxu0 %v731_v23 }
  0x18   :  { %684 = vmatprep.subr.bf16.mxu0 %v732_v26 }
  0x19   :  { %720 = vmatpush3.bf16.msra.mxu1 %v732_v26 }
  0x1a   :  { %713 = vmatprep.subr.bf16.mxu1 %v733_v29 }
  0x1b   :  { %685 = vmatpush3.bf16.msra.mxu0 %v732_v26  ;;  %v553_v26 = vld [vmem:[%s898_s4] ss:$0 sm:$0xff]  ;;  %s760_s4 = smov [#allocation2]  }
  0x1c   :  { %686 = vmatprep.subr.bf16.mxu0 %v733_v29  ;;  %s524_s17 = sshll.u32 %s760_s4, 4  ;;  %s525_s17 = int_to_ptr.vmem [resolvable:$true] %s524_s17 }
  0x1d   :  { %721 = vmatpush3.bf16.msra.mxu1 %v733_v29  ;;  %s736_s18 = scalar_lea.vmem %s525_s17, 1024  ;;  %p741_p1 = scmp.lt.s32.totalorder %s525_s17, %s525_s17 }
  0x1e   :  { %673 = vmatmul.mubr.msk.bf16.gmra.mrb[12].mxu0 %vm55_vm0, %v46_v30  ;;  %714 = vmatprep.subr.bf16.mxu1 %v734_v31  ;;  %p737_p0 = scmp.ne.s32.totalorder %s525_s17, %s736_s18  ;;  %p742_p2 = scmp.lt.s32.totalorder %s736_s18, %s736_s18 }
  0x1f   :  { %687 = vmatpush3.bf16.msra.mxu0 %v733_v29 }
  0x20   :  { %688 = vmatprep.subr.bf16.mxu0 %v734_v31  ;;  %p743_p3 = por %p742_p2, %p741_p1 }
  0x21   :  { %722 = vmatpush3.bf16.msra.mxu1 %v734_v31 }
  0x22   :  { %715 = vmatprep.subr.bf16.mxu1 %v735_v32  ;;  %p744_p4 = pnand %p743_p3, %p737_p0 }
  0x23   :  { %689 = vmatpush3.bf16.msra.mxu0 %v734_v31 }
  0x24   :  { %690 = vmatprep.subr.bf16.mxu0 %v735_v32 }
  0x25   :  { %723 = vmatpush3.bf16.msra.mxu1 %v735_v32 }
  0x27   :  { %691 = vmatpush3.bf16.msra.mxu0 %v735_v32 }
  0xd9   :  { %v662_v34 = vpop.f32.mrb[0].mxu0 }
  0xda   :  { %v185_v35 = vadd.f32 %v662_v34, %v544_v33  ;;  %v114_v36 = vpop.f32.mrb[1].mxu0 }
  0xdb   :  { %v183_v37 = vadd.f32 %v544_v33, %v114_v36  ;;  %v663_v38 = vpop.f32.mrb[2].mxu0 }
  0xdc   :  { %v186_v39 = vadd.f32 %v663_v38, %v544_v33  ;;  %v117_v40 = vpop.f32.mrb[3].mxu0  ;;  %v201_v42 = vmax.f32 %v185_v35, 0.0 }
  0xdd   :  { %v184_v41 = vadd.f32 %v544_v33, %v117_v40  ;;  %v199_v44 = vmax.f32 %v183_v37, 0.0 }
  0xde   :  { %v202_v43 = vmax.f32 %v186_v39, 0.0 }
  0xdf   :  { %v200_v45 = vmax.f32 %v184_v41, 0.0 }
  0xe0   :  { %v217_v46 = vpack.c.bf16 %v202_v43, %v201_v42 }
  0xe1   :  { %v216_v47 = vpack.c.bf16 %v200_v45, %v199_v44  ;;  %v666_v48 = vpop.f32.mrb[4].mxu0 }
  0xe2   :  { %v189_v49 = vadd.f32 %v666_v48, %v544_v33  ;;  %v130_v50 = vpop.f32.mrb[5].mxu0 }
  0xe3   :  { %v187_v51 = vadd.f32 %v544_v33, %v130_v50  ;;  %692 = vmatprep.mubr.bf16.mxu0 %v216_v47  ;;  %v667_v52 = vpop.f32.mrb[6].mxu0 }
  0xe4   :  { %v205_v53 = vmax.f32 %v189_v49, 0.0  ;;  %v190_v54 = vadd.f32 %v667_v52, %v544_v33  ;;  %693 = vmatmul.mubr.bf16.vlgmr.msra.gmra.mrb[16].mxu0 %v217_v46  ;;  %v133_v55 = vpop.f32.mrb[7].mxu0 }
  0xe5   :  { %v203_v56 = vmax.f32 %v187_v51, 0.0  ;;  %v188_v57 = vadd.f32 %v544_v33, %v133_v55 }
  0xe6   :  { %v206_v58 = vmax.f32 %v190_v54, 0.0 }
  0xe7   :  { %v204_v59 = vmax.f32 %v188_v57, 0.0 }
  0xe8   :  { %v219_v60 = vpack.c.bf16 %v206_v58, %v205_v53 }
  0xe9   :  { %v218_v61 = vpack.c.bf16 %v204_v59, %v203_v56  ;;  %v670_v62 = vpop.f32.mrb[8].mxu0 }
  0xea   :  { %v193_v63 = vadd.f32 %v670_v62, %v544_v33  ;;  %v146_v0 = vpop.f32.mrb[9].mxu0 }
  0xeb   :  { %696 = vmatprep.mubr.bf16.mxu1 %v218_v61  ;;  %v191_v1 = vadd.f32 %v544_v33, %v146_v0  ;;  %v671_v2 = vpop.f32.mrb[10].mxu0 }
  0xec   :  { %697 = vmatmul.mubr.bf16.vlgmr.msra.gmra.mrb[0].mxu1 %v219_v60  ;;  %v209_v3 = vmax.f32 %v193_v63, 0.0  ;;  %v194_v4 = vadd.f32 %v671_v2, %v544_v33  ;;  %v149_v5 = vpop.f32.mrb[11].mxu0 }
  0xed   :  { %v207_v6 = vmax.f32 %v191_v1, 0.0  ;;  %v192_v7 = vadd.f32 %v544_v33, %v149_v5 }
  0xee   :  { %v210_v8 = vmax.f32 %v194_v4, 0.0 }
  0xef   :  { %v208_v9 = vmax.f32 %v192_v7, 0.0 }
  0xf0   :  { %v221_v10 = vpack.c.bf16 %v210_v8, %v209_v3 }
  0xf1   :  { %v220_v11 = vpack.c.bf16 %v208_v9, %v207_v6  ;;  %v674_v12 = vpop.f32.mrb[12].mxu0 }
  0xf2   :  { %v197_v13 = vadd.f32 %v674_v12, %v544_v33  ;;  %v162_v14 = vpop.f32.mrb[13].mxu0 }
  0xf3   :  { %700 = vmatprep.mubr.bf16.mxu1 %v220_v11  ;;  %v195_v15 = vadd.f32 %v544_v33, %v162_v14  ;;  %v675_v16 = vpop.f32.mrb[14].mxu0 }
  0xf4   :  { %701 = vmatmul.mubr.bf16.gmra.mrb[4].mxu1 %v221_v10  ;;  %v213_v17 = vmax.f32 %v197_v13, 0.0  ;;  %v198_v18 = vadd.f32 %v675_v16, %v544_v33  ;;  %v165_v19 = vpop.f32.mrb[15].mxu0 }
  0xf5   :  { %v211_v20 = vmax.f32 %v195_v15, 0.0  ;;  %v196_v21 = vadd.f32 %v544_v33, %v165_v19 }
  0xf6   :  { %v214_v22 = vmax.f32 %v198_v18, 0.0 }
  0xf7   :  { %v212_v23 = vmax.f32 %v196_v21, 0.0 }
  0xf8   :  { %v223_v24 = vpack.c.bf16 %v214_v22, %v213_v17 }
  0xf9   :  { %v222_v25 = vpack.c.bf16 %v212_v23, %v211_v20 }
  0xfb   :  { %704 = vmatprep.mubr.bf16.mxu1 %v222_v25 }
  0xfc   :  { %705 = vmatmul.mubr.bf16.gmra.mrb[8].mxu1 %v223_v24 }
 0x1b7   :  { %v694_v27 = vpop.f32.mrb[16].mxu0 }
 0x1b8   :  { %v322_v28 = vpop.f32.mrb[17].mxu0  ;;  %v393_v35 = vadd.f32 %v694_v27, %v553_v26 }
 0x1b9   :  { %v695_v29 = vpop.f32.mrb[18].mxu0  ;;  %v391_v30 = vadd.f32 %v553_v26, %v322_v28 }
 0x1ba   :  { %v325_v31 = vpop.f32.mrb[19].mxu0  ;;  %v394_v38 = vadd.f32 %v695_v29, %v553_v26 }
 0x1bb   :  { %407 = vxpose.xlu0.b32.start [1/16] %v391_v30, 128  ;;  %v392_v32 = vadd.f32 %v553_v26, %v325_v31 }
 0x1bf   :  { %408 = vxpose.xlu0.b32.cont [2/16] %v392_v32, 128  ;;  %v698_v34 = vpop.f32.mrb[0].mxu1 }
 0x1c0   :  { %v338_v33 = vpop.f32.mrb[1].mxu1  ;;  %v397_v47 = vadd.f32 %v698_v34, %v553_v26 }
 0x1c1   :  { %v699_v36 = vpop.f32.mrb[2].mxu1  ;;  %v395_v41 = vadd.f32 %v553_v26, %v338_v33 }
 0x1c2   :  { %v341_v37 = vpop.f32.mrb[3].mxu1  ;;  %v398_v50 = vadd.f32 %v699_v36, %v553_v26 }
 0x1c3   :  { %409 = vxpose.xlu0.b32.cont [3/16] %v393_v35, 128  ;;  %v396_v44 = vadd.f32 %v553_v26, %v341_v37 }
 0x1c7   :  { %410 = vxpose.xlu0.b32.cont [4/16] %v394_v38, 128  ;;  %v702_v39 = vpop.f32.mrb[4].mxu1 }
 0x1c8   :  { %v354_v40 = vpop.f32.mrb[5].mxu1  ;;  %v401_v53 = vadd.f32 %v702_v39, %v553_v26 }
 0x1c9   :  { %v703_v42 = vpop.f32.mrb[6].mxu1  ;;  %v399_v51 = vadd.f32 %v553_v26, %v354_v40 }
 0x1ca   :  { %v357_v43 = vpop.f32.mrb[7].mxu1  ;;  %v402_v54 = vadd.f32 %v703_v42, %v553_v26 }
 0x1cb   :  { %411 = vxpose.xlu0.b32.cont [5/16] %v395_v41, 128  ;;  %v400_v52 = vadd.f32 %v553_v26, %v357_v43 }
 0x1cf   :  { %412 = vxpose.xlu0.b32.cont [6/16] %v396_v44, 128  ;;  %v706_v45 = vpop.f32.mrb[8].mxu1 }
 0x1d0   :  { %v370_v46 = vpop.f32.mrb[9].mxu1  ;;  %v405_v57 = vadd.f32 %v706_v45, %v553_v26 }
 0x1d1   :  { %v707_v48 = vpop.f32.mrb[10].mxu1  ;;  %v403_v55 = vadd.f32 %v553_v26, %v370_v46 }
 0x1d2   :  { %v373_v49 = vpop.f32.mrb[11].mxu1  ;;  %v406_v58 = vadd.f32 %v707_v48, %v553_v26 }
 0x1d3   :  { %413 = vxpose.xlu0.b32.cont [7/16] %v397_v47, 128  ;;  %v404_v56 = vadd.f32 %v553_v26, %v373_v49 }
 0x1d7   :  { %414 = vxpose.xlu0.b32.cont [8/16] %v398_v50, 128 }
 0x1db   :  { %415 = vxpose.xlu0.b32.cont [9/16] %v399_v51, 128 }
 0x1df   :  { %416 = vxpose.xlu0.b32.cont [10/16] %v400_v52, 128 }
 0x1e3   :  { %417 = vxpose.xlu0.b32.cont [11/16] %v401_v53, 128 }
 0x1e7   :  { %418 = vxpose.xlu0.b32.cont [12/16] %v402_v54, 128 }
 0x1eb   :  { %419 = vxpose.xlu0.b32.cont [13/16] %v403_v55, 128 }
 0x1ef   :  { %420 = vxpose.xlu0.b32.cont [14/16] %v404_v56, 128 }
 0x1f3   :  { %421 = vxpose.xlu0.b32.cont [15/16] %v405_v57, 128 }
 0x1f7   :  { %422 = vxpose.xlu0.b32.end [16/16] %v406_v58, 128 }
 0x23b   :  { %v423_v59 = vpop.trf.xlu0 }
 0x23f   :  { %v424_v60 = vpop.trf.xlu0 }
 0x240   :  { %v589_v61 = vpack.c.bf16 %v424_v60, %v423_v59 }
 0x242   :  { %590 = vst [vmem:[#allocation2] sm:$0xff] %v589_v61  }
 0x243   :  { %v425_v62 = vpop.trf.xlu0 }
 0x247   :  { %v426_v63 = vpop.trf.xlu0 }
 0x248   :  { %v594_v0 = vpack.c.bf16 %v426_v63, %v425_v62 }
 0x24a   :  { %626 = vst [vmem:[#allocation2 + $0x8] sm:$0xff] %v594_v0  }
 0x24b   :  { %v427_v1 = vpop.trf.xlu0 }
 0x24f   :  { %v428_v2 = vpop.trf.xlu0 }
 0x250   :  { %v599_v3 = vpack.c.bf16 %v428_v2, %v427_v1 }
 0x252   :  { %627 = vst [vmem:[#allocation2 + $0x10] sm:$0xff] %v599_v3  }
 0x253   :  { %v429_v4 = vpop.trf.xlu0 }
 0x257   :  { %v430_v5 = vpop.trf.xlu0 }
 0x258   :  { %v604_v6 = vpack.c.bf16 %v430_v5, %v429_v4 }
 0x25a   :  { %628 = vst [vmem:[#allocation2 + $0x18] sm:$0xff] %v604_v6  }
 0x25b   :  { %v431_v7 = vpop.trf.xlu0 }
 0x25f   :  { %v432_v8 = vpop.trf.xlu0 }
 0x260   :  { %v609_v9 = vpack.c.bf16 %v432_v8, %v431_v7 }
 0x262   :  { %629 = vst [vmem:[#allocation2 + $0x20] sm:$0xff] %v609_v9  }
 0x263   :  { %v433_v10 = vpop.trf.xlu0 }
 0x267   :  { %v434_v11 = vpop.trf.xlu0 }
 0x268   :  { %v614_v12 = vpack.c.bf16 %v434_v11, %v433_v10 }
 0x26a   :  { %630 = vst [vmem:[#allocation2 + $0x28] sm:$0xff] %v614_v12  }
 0x26b   :  { %v435_v13 = vpop.trf.xlu0 }
 0x26f   :  { %v436_v14 = vpop.trf.xlu0 }
 0x270   :  { %v619_v15 = vpack.c.bf16 %v436_v14, %v435_v13 }
 0x272   :  { %631 = vst [vmem:[#allocation2 + $0x30] sm:$0xff] %v619_v15  }
 0x273   :  { %v437_v16 = vpop.trf.xlu0 }
 0x277   :  { %v438_v17 = vpop.trf.xlu0 }
 0x278   :  { %v624_v18 = vpack.c.bf16 %v438_v17, %v437_v16 }
 0x27a   :  { %632 = vst [vmem:[#allocation2 + $0x38] sm:$0xff] %v624_v18  }
 0x27b   :  { %747 = shalt.err (!%p744_p4)
}
 0x27c   :  { %s748_s21 = scalar_lea.hbm %s899_s5, 1024 }
 0x27d   :  { %p749_p5 = scmp.ne.s32.totalorder %s899_s5, %s748_s21  ;;  %p752_p6 = scmp.lt.u32.totalorder %s748_s21, %s899_s5 }
 0x27f   :  { %p754_p7 = pnand %p752_p6, %p749_p5 }
 0x281   :  { %757 = shalt.err (!%p754_p7)
}
 0x282   :  { %s761_s26 = smov 64   ;;  %s762_s27 = smov 4  }
 0x283   :  { %530 = dma.vmem_to_hbm [thread:$0]  %s525_s17, 1024, %s899_s5, [#allocation3], %s761_s26, %s761_s26, %s762_s27  }
 0x284   :  { %758 = dma.done.wait [#allocation3], 1024  }
 0x285   :  { %759 = vsyncadd [#allocation3], 4294966272 }
 0x286   :  { %534 = vsyncpa [#allocation3], 1 }

</bundles_post_ra>
